<compile_context>
chip_gen: v5e
topology: v5e:2x2
jax: 0.10.0
libtpu: 0.0.40
codegen_flags: <defaults>
</compile_context>

<pallas_src>
import functools

import jax
import jax.numpy as jnp
from jax import lax
from jax.experimental import pallas as pl
from jax.experimental.pallas import tpu as pltpu


# ----------------------------- kernel bodies ---------------------------------

def _attend_one(x_bf16, w, b, out_dtype):
    """Attention for one batch element. x_bf16: (S, E) bf16, w: (E, 3E) bf16, b: (1, 3E) f32."""
    E = w.shape[0]
    # Fused QKV projection: one MXU pass with N = 3E; bias add is a sublane broadcast (1,3E)+(S,3E).
    qkv = jnp.dot(x_bf16, w, preferred_element_type=jnp.float32) + b            # (S, 3E) f32
    # Lane-aligned static slices (E is a multiple of 128).
    q = qkv[:, :E].astype(x_bf16.dtype)
    k = qkv[:, E:2 * E].astype(x_bf16.dtype)
    v = qkv[:, 2 * E:].astype(x_bf16.dtype)
    # Scores (S, S): contract last axes directly -- no materialized k.T.
    # NOTE: no 1/sqrt(E) scaling, matching the reference PyTorch module.
    s = lax.dot_general(q, k,
                        dimension_numbers=(((1,), (1,)), ((), ())),
                        preferred_element_type=jnp.float32)
    # Numerically stable softmax with an exact divide (rows sum to 1).
    s = s - jnp.max(s, axis=-1, keepdims=True)
    e = jnp.exp(s)
    p = e / jnp.sum(e, axis=-1, keepdims=True)
    out = jnp.dot(p.astype(x_bf16.dtype), v, preferred_element_type=jnp.float32)
    return out.astype(out_dtype)


def _self_attention_kernel_merged(x_ref, w_ref, b_ref, o_ref):
    # Single grid step: x_ref (B, S, E) f32, w_ref (E, 3E) bf16, b_ref (1, 3E) f32, o_ref (B, S, E) f32.
    w = w_ref[...]
    b = b_ref[...]
    for bi in range(x_ref.shape[0]):          # B is tiny and static -> unrolled at trace time
        o_ref[bi] = _attend_one(x_ref[bi].astype(jnp.bfloat16), w, b, o_ref.dtype)


def _self_attention_kernel_per_batch(x_ref, w_ref, b_ref, o_ref):
    # grid=(B,): x_ref (1, S, E) f32 block for the current batch element.
    o_ref[0] = _attend_one(x_ref[0].astype(jnp.bfloat16), w_ref[...], b_ref[...], o_ref.dtype)


# ------------------------------- wrappers -------------------------------------

def fuse_qkv_weights(wq, bq, wk, bk, wv, bv):
    """Fuse torch-layout (out, in) q/k/v weights once, at weight-load time (NOT per call)."""
    w_qkv = jnp.concatenate([wq.T, wk.T, wv.T], axis=1).astype(jnp.bfloat16)    # (E, 3E)
    b_qkv = jnp.concatenate([bq, bk, bv]).reshape(1, -1).astype(jnp.float32)    # (1, 3E)
    return w_qkv, b_qkv


def _is_multi_tensorcore_chip():
    # Only v7x has 2 TensorCores per chip; on v5e/v6e a batch grid is a pure serial loop.
    try:
        kind = jax.devices()[0].device_kind.lower()
    except Exception:
        return False
    return "v7" in kind


def self_attention(x, w_qkv, b_qkv):
    """x: (B, S, E) float32. w_qkv: (E, 3E) bf16 fused. b_qkv: (1, 3E) f32 fused."""
    B, S, E = x.shape
    E3 = w_qkv.shape[1]

    flops = B * (2 * S * E * E3 + 2 * S * S * E + 2 * S * S * E)
    bytes_accessed = (B * S * E * 4        # x (f32)
                      + E * E3 * 2         # fused weights (bf16)
                      + E3 * 4             # fused bias (f32)
                      + B * S * E * 4)     # output (f32)
    cost = pl.CostEstimate(flops=flops,
                           transcendentals=B * S * S,
                           bytes_accessed=bytes_accessed)

    if _is_multi_tensorcore_chip():
        # v7x: one batch element per grid step, split across the two TensorCores.
        grid_spec = pltpu.PrefetchScalarGridSpec(
            num_scalar_prefetch=0,
            grid=(B,),
            in_specs=[
                pl.BlockSpec((1, S, E), lambda b: (b, 0, 0)),
                pl.BlockSpec((E, E3), lambda b: (0, 0)),   # grid-invariant weights
                pl.BlockSpec((1, E3), lambda b: (0, 0)),   # grid-invariant bias
            ],
            out_specs=pl.BlockSpec((1, S, E), lambda b: (b, 0, 0)),
        )
        kernel = _self_attention_kernel_per_batch
        dims = ("parallel",)
    else:
        # v5e/v6e (single TC): one grid step over the whole batch -- no per-step pipeline overhead.
        grid_spec = pltpu.PrefetchScalarGridSpec(
            num_scalar_prefetch=0,
            grid=(1,),
            in_specs=[
                pl.BlockSpec((B, S, E), lambda i: (0, 0, 0)),
                pl.BlockSpec((E, E3), lambda i: (0, 0)),
                pl.BlockSpec((1, E3), lambda i: (0, 0)),
            ],
            out_specs=pl.BlockSpec((B, S, E), lambda i: (0, 0, 0)),
        )
        kernel = _self_attention_kernel_merged
        dims = ("arbitrary",)

    return pl.pallas_call(
        kernel,
        out_shape=jax.ShapeDtypeStruct((B, S, E), jnp.float32),
        grid_spec=grid_spec,
        compiler_params=pltpu.CompilerParams(dimension_semantics=dims),
        cost_estimate=cost,
    )(x, w_qkv, b_qkv)


# ------------------------------- references -----------------------------------

def self_attention_ref_f32(x, wq, bq, wk, bk, wv, bv):
    q = jnp.einsum("bse,fe->bsf", x, wq) + bq
    k = jnp.einsum("bse,fe->bsf", x, wk) + bk
    v = jnp.einsum("bse,fe->bsf", x, wv) + bv
    s = jnp.einsum("bqe,bke->bqk", q, k)
    p = jax.nn.softmax(s, axis=-1)
    return jnp.einsum("bqk,bke->bqe", p, v)


def self_attention_ref_bf16(x, wq, bq, wk, bk, wv, bv):
    # Mirrors the kernel's precision choices (bf16 matmul operands, f32 accumulation, exact softmax).
    bf = jnp.bfloat16
    E = x.shape[-1]
    xb = x.astype(bf)
    w_qkv = jnp.concatenate([wq.T, wk.T, wv.T], axis=1).astype(bf)
    b_qkv = jnp.concatenate([bq, bk, bv]).astype(jnp.float32)
    qkv = jnp.einsum("bse,ef->bsf", xb, w_qkv,
                     preferred_element_type=jnp.float32) + b_qkv
    q = qkv[..., :E].astype(bf)
    k = qkv[..., E:2 * E].astype(bf)
    v = qkv[..., 2 * E:].astype(bf)
    s = jnp.einsum("bqe,bke->bqk", q, k, preferred_element_type=jnp.float32)
    p = jax.nn.softmax(s, axis=-1).astype(bf)
    return jnp.einsum("bqk,bke->bqe", p, v, preferred_element_type=jnp.float32)


# --------------------------------- main ----------------------------------------

if __name__ == "__main__":
    B, S, E = 2, 30, 128   # matches the PyTorch example x = torch.randn(2, 30, 128)

    key = jax.random.PRNGKey(0)
    kx, kq, kbq, kk, kbk, kv, kbv = jax.random.split(key, 7)

    x = jax.random.normal(kx, (B, S, E), dtype=jnp.float32)

    # deterministic parameter init (mimics nn.Linear uniform(-1/sqrt(E), 1/sqrt(E)))
    bound = 1.0 / (E ** 0.5)
    init = functools.partial(jax.random.uniform, minval=-bound, maxval=bound,
                             dtype=jnp.float32)
    wq = init(kq, (E, E)); bq = init(kbq, (E,))
    wk = init(kk, (E, E)); bk = init(kbk, (E,))
    wv = init(kv, (E, E)); bv = init(kbv, (E,))

    # Weight fusion done ONCE, outside the call path (as it would be at weight-load time).
    w_qkv, b_qkv = fuse_qkv_weights(wq, bq, wk, bk, wv, bv)
    w_qkv = jax.block_until_ready(w_qkv)
    b_qkv = jax.block_until_ready(b_qkv)

    out = self_attention(x, w_qkv, b_qkv)
    out = jax.block_until_ready(out)
    assert out.shape == (B, S, E)

    # Tight check vs a precision-matched (bf16-operand) reference.
    ref_bf16 = self_attention_ref_bf16(x, wq, bq, wk, bk, wv, bv)
    assert jnp.allclose(out, ref_bf16, atol=1e-2, rtol=1e-2), "mismatch vs bf16-matched reference"

    # Loose sanity check vs the full-f32 reference (bf16 operand rounding dominates the gap).
    ref_f32 = self_attention_ref_f32(x, wq, bq, wk, bk, wv, bv)
    assert jnp.allclose(out, ref_f32, atol=1e-1, rtol=1e-1), "mismatch vs f32 reference"

    print("KERNEL_OK")
</pallas_src>

<mosaic_0001>
module attributes {stable_mosaic.version = 11 : i64} {
  func.func @_self_attention_kernel_merged(%arg0: i32, %arg1: memref<2x30x128xf32, #tpu.memory_space<vmem>>, %arg2: memref<128x384xbf16, #tpu.memory_space<vmem>>, %arg3: memref<1x384xf32, #tpu.memory_space<vmem>>, %arg4: memref<2x30x128xf32, #tpu.memory_space<vmem>>) attributes {dimension_semantics = [#tpu.dimension_semantics<arbitrary>], iteration_bounds = array<i64: 1>, scalar_prefetch = 0 : i64, scratch_operands = 0 : i64, tpu.core_type = #tpu.core_type<tc>, window_params = [{pipeline_mode = #tpu.pipeline_mode<synchronous>, transform_indices = @transform_0, window_bounds = array<i64: 2, 30, 128>}, {pipeline_mode = #tpu.pipeline_mode<synchronous>, transform_indices = @transform_1, window_bounds = array<i64: 128, 384>}, {pipeline_mode = #tpu.pipeline_mode<synchronous>, transform_indices = @transform_2, window_bounds = array<i64: 1, 384>}, {pipeline_mode = #tpu.pipeline_mode<synchronous>, transform_indices = @transform_3, window_bounds = array<i64: 2, 30, 128>}]} {
    %c0 = arith.constant 0 : index
    %c0_0 = arith.constant 0 : index
    %0 = vector.load %arg2[%c0, %c0_0] : memref<128x384xbf16, #tpu.memory_space<vmem>>, vector<128x384xbf16>
    %c0_1 = arith.constant 0 : index
    %c0_2 = arith.constant 0 : index
    %1 = vector.load %arg3[%c0_1, %c0_2] : memref<1x384xf32, #tpu.memory_space<vmem>>, vector<1x384xf32>
    %c0_3 = arith.constant 0 : index
    %c0_4 = arith.constant 0 : index
    %c0_5 = arith.constant 0 : index
    %2 = vector.load %arg1[%c0_3, %c0_4, %c0_5] : memref<2x30x128xf32, #tpu.memory_space<vmem>>, vector<1x30x128xf32>
    %3 = vector.shape_cast %2 : vector<1x30x128xf32> to vector<30x128xf32>
    %4 = arith.truncf %3 : vector<30x128xf32> to vector<30x128xbf16>
    %cst = arith.constant dense<0.000000e+00> : vector<30x384xf32>
    %5 = tpu.matmul %4, %0, %cst {dimension_numbers = #tpu.dot_dimension_numbers<[1], [0], [0], [1], [0, 0, 1, 1], [], []>} : vector<30x128xbf16>, vector<128x384xbf16>, vector<30x384xf32> -> vector<30x384xf32>
    %6 = vector.broadcast %1 : vector<1x384xf32> to vector<30x384xf32>
    %7 = arith.addf %5, %6 : vector<30x384xf32>
    %8 = vector.extract_strided_slice %7 {offsets = [0, 0], sizes = [30, 128], strides = [1, 1]} : vector<30x384xf32> to vector<30x128xf32>
    %9 = arith.truncf %8 : vector<30x128xf32> to vector<30x128xbf16>
    %10 = vector.extract_strided_slice %7 {offsets = [0, 128], sizes = [30, 128], strides = [1, 1]} : vector<30x384xf32> to vector<30x128xf32>
    %11 = arith.truncf %10 : vector<30x128xf32> to vector<30x128xbf16>
    %12 = vector.extract_strided_slice %7 {offsets = [0, 256], sizes = [30, 128], strides = [1, 1]} : vector<30x384xf32> to vector<30x128xf32>
    %13 = arith.truncf %12 : vector<30x128xf32> to vector<30x128xbf16>
    %cst_6 = arith.constant dense<0.000000e+00> : vector<30x30xf32>
    %14 = tpu.matmul %9, %11, %cst_6 {dimension_numbers = #tpu.dot_dimension_numbers<[1], [1], [0], [0], [0, 0, 1, 0], [], []>} : vector<30x128xbf16>, vector<30x128xbf16>, vector<30x30xf32> -> vector<30x30xf32>
    %cst_7 = arith.constant dense<0xFF800000> : vector<30xf32>
    %15 = vector.multi_reduction <maximumf>, %14, %cst_7 [1] : vector<30x30xf32> to vector<30xf32>
    %16 = vector.shape_cast %15 : vector<30xf32> to vector<30x1xf32>
    %17 = vector.broadcast %16 : vector<30x1xf32> to vector<30x30xf32>
    %18 = arith.subf %14, %17 : vector<30x30xf32>
    %19 = math.exp %18 : vector<30x30xf32>
    %cst_8 = arith.constant dense<0.000000e+00> : vector<30xf32>
    %20 = vector.multi_reduction <add>, %19, %cst_8 [1] : vector<30x30xf32> to vector<30xf32>
    %21 = vector.shape_cast %20 : vector<30xf32> to vector<30x1xf32>
    %22 = vector.broadcast %21 : vector<30x1xf32> to vector<30x30xf32>
    %23 = arith.divf %19, %22 : vector<30x30xf32>
    %24 = arith.truncf %23 : vector<30x30xf32> to vector<30x30xbf16>
    %cst_9 = arith.constant dense<0.000000e+00> : vector<30x128xf32>
    %25 = tpu.matmul %24, %13, %cst_9 {dimension_numbers = #tpu.dot_dimension_numbers<[1], [0], [0], [1], [0, 0, 1, 1], [], []>} : vector<30x30xbf16>, vector<30x128xbf16>, vector<30x128xf32> -> vector<30x128xf32>
    %c0_10 = arith.constant 0 : index
    %c0_11 = arith.constant 0 : index
    %c0_12 = arith.constant 0 : index
    %26 = vector.load %arg4[%c0_10, %c0_11, %c0_12] : memref<2x30x128xf32, #tpu.memory_space<vmem>>, vector<1x30x128xf32>
    %27 = vector.shape_cast %26 : vector<1x30x128xf32> to vector<30x128xf32>
    %28 = vector.shape_cast %25 : vector<30x128xf32> to vector<1x30x128xf32>
    tpu.vector_store %arg4[%c0_10, %c0_11, %c0_12], %28 {strides = array<i32>} : memref<2x30x128xf32, #tpu.memory_space<vmem>>, vector<1x30x128xf32>,
    %c1 = arith.constant 1 : index
    %c0_13 = arith.constant 0 : index
    %c0_14 = arith.constant 0 : index
    %29 = vector.load %arg1[%c1, %c0_13, %c0_14] : memref<2x30x128xf32, #tpu.memory_space<vmem>>, vector<1x30x128xf32>
    %30 = vector.shape_cast %29 : vector<1x30x128xf32> to vector<30x128xf32>
    %31 = arith.truncf %30 : vector<30x128xf32> to vector<30x128xbf16>
    %cst_15 = arith.constant dense<0.000000e+00> : vector<30x384xf32>
    %32 = tpu.matmul %31, %0, %cst_15 {dimension_numbers = #tpu.dot_dimension_numbers<[1], [0], [0], [1], [0, 0, 1, 1], [], []>} : vector<30x128xbf16>, vector<128x384xbf16>, vector<30x384xf32> -> vector<30x384xf32>
    %33 = vector.broadcast %1 : vector<1x384xf32> to vector<30x384xf32>
    %34 = arith.addf %32, %33 : vector<30x384xf32>
    %35 = vector.extract_strided_slice %34 {offsets = [0, 0], sizes = [30, 128], strides = [1, 1]} : vector<30x384xf32> to vector<30x128xf32>
    %36 = arith.truncf %35 : vector<30x128xf32> to vector<30x128xbf16>
    %37 = vector.extract_strided_slice %34 {offsets = [0, 128], sizes = [30, 128], strides = [1, 1]} : vector<30x384xf32> to vector<30x128xf32>
    %38 = arith.truncf %37 : vector<30x128xf32> to vector<30x128xbf16>
    %39 = vector.extract_strided_slice %34 {offsets = [0, 256], sizes = [30, 128], strides = [1, 1]} : vector<30x384xf32> to vector<30x128xf32>
    %40 = arith.truncf %39 : vector<30x128xf32> to vector<30x128xbf16>
    %cst_16 = arith.constant dense<0.000000e+00> : vector<30x30xf32>
    %41 = tpu.matmul %36, %38, %cst_16 {dimension_numbers = #tpu.dot_dimension_numbers<[1], [1], [0], [0], [0, 0, 1, 0], [], []>} : vector<30x128xbf16>, vector<30x128xbf16>, vector<30x30xf32> -> vector<30x30xf32>
    %cst_17 = arith.constant dense<0xFF800000> : vector<30xf32>
    %42 = vector.multi_reduction <maximumf>, %41, %cst_17 [1] : vector<30x30xf32> to vector<30xf32>
    %43 = vector.shape_cast %42 : vector<30xf32> to vector<30x1xf32>
    %44 = vector.broadcast %43 : vector<30x1xf32> to vector<30x30xf32>
    %45 = arith.subf %41, %44 : vector<30x30xf32>
    %46 = math.exp %45 : vector<30x30xf32>
    %cst_18 = arith.constant dense<0.000000e+00> : vector<30xf32>
    %47 = vector.multi_reduction <add>, %46, %cst_18 [1] : vector<30x30xf32> to vector<30xf32>
    %48 = vector.shape_cast %47 : vector<30xf32> to vector<30x1xf32>
    %49 = vector.broadcast %48 : vector<30x1xf32> to vector<30x30xf32>
    %50 = arith.divf %46, %49 : vector<30x30xf32>
    %51 = arith.truncf %50 : vector<30x30xf32> to vector<30x30xbf16>
    %cst_19 = arith.constant dense<0.000000e+00> : vector<30x128xf32>
    %52 = tpu.matmul %51, %40, %cst_19 {dimension_numbers = #tpu.dot_dimension_numbers<[1], [0], [0], [1], [0, 0, 1, 1], [], []>} : vector<30x30xbf16>, vector<30x128xbf16>, vector<30x128xf32> -> vector<30x128xf32>
    %c1_20 = arith.constant 1 : index
    %c0_21 = arith.constant 0 : index
    %c0_22 = arith.constant 0 : index
    %53 = vector.load %arg4[%c1_20, %c0_21, %c0_22] : memref<2x30x128xf32, #tpu.memory_space<vmem>>, vector<1x30x128xf32>
    %54 = vector.shape_cast %53 : vector<1x30x128xf32> to vector<30x128xf32>
    %55 = vector.shape_cast %52 : vector<30x128xf32> to vector<1x30x128xf32>
    tpu.vector_store %arg4[%c1_20, %c0_21, %c0_22], %55 {strides = array<i32>} : memref<2x30x128xf32, #tpu.memory_space<vmem>>, vector<1x30x128xf32>,
    return
  }
  func.func @transform_0(%arg0: i32) -> (i32, i32, i32) {
    %c0_i32 = arith.constant 0 : i32
    %c0_i32_0 = arith.constant 0 : i32
    %c0_i32_1 = arith.constant 0 : i32
    %c0_i32_2 = arith.constant 0 : i32
    return %c0_i32, %c0_i32_0, %c0_i32_1 : i32, i32, i32
  }
  func.func @transform_1(%arg0: i32) -> (i32, i32) {
    %c0_i32 = arith.constant 0 : i32
    %c0_i32_0 = arith.constant 0 : i32
    %c0_i32_1 = arith.constant 0 : i32
    return %c0_i32, %c0_i32_0 : i32, i32
  }
  func.func @transform_2(%arg0: i32) -> (i32, i32) {
    %c0_i32 = arith.constant 0 : i32
    %c0_i32_0 = arith.constant 0 : i32
    %c0_i32_1 = arith.constant 0 : i32
    return %c0_i32, %c0_i32_0 : i32, i32
  }
  func.func @transform_3(%arg0: i32) -> (i32, i32, i32) {
    %c0_i32 = arith.constant 0 : i32
    %c0_i32_0 = arith.constant 0 : i32
    %c0_i32_1 = arith.constant 0 : i32
    %c0_i32_2 = arith.constant 0 : i32
    return %c0_i32, %c0_i32_0, %c0_i32_1 : i32, i32, i32
  }
}

</mosaic_0001>

<bundles_post_ra>
// kernel: tpu_custom_call.1
= control target key start
LH: loop header
LB: loop body
LE: loop exit
PB: predicated region body
PF: predicated region fallthrough
CT: control target
= control target key end

     0   :  { %8 = vsyncpa [#allocation3], 0  ;;  %s840_s15 = smov [#allocation2]   ;;  %s841_s17 = smov 192   ;;  %s1026_s0 = inlined_call_operand.vmem [shape: f32[2,30,128], index: 0, kind: input, shape index: {}]   ;;  %s1027_s1 = inlined_call_operand.hbm [shape: bf16[128,384], index: 1, kind: input, shape index: {}]   ;;  %s1028_s2 = inlined_call_operand.vmem [shape: f32[1,384], index: 2, kind: input, shape index: {}]   ;;  %s1029_s3 = inlined_call_operand.vmem [shape: f32[2,30,128], index: 3, kind: output, shape index: {}]  }
   0x1   :  { %s15_s14 = sshll.u32 %s1027_s1, 4  ;;  %s17_s16 = sshll.u32 %s840_s15, 4  ;;  %s16_s14 = int_to_ptr.hbm [resolvable:$true] %s15_s14  ;;  %s18_s16 = int_to_ptr.vmem [resolvable:$true] %s17_s16 }
   0x2   :  { %s842_s18 = smov 12  }
   0x3   :  { %23 = dma.hbm_to_vmem [thread:$0]  %s16_s14, 3072, %s18_s16, [#allocation3], %s841_s17, %s841_s17, %s842_s18  }
   0x4   :  { %838 = dma.done.wait [#allocation3], 3072  }
   0x5   :  { %839 = vsyncadd [#allocation3], 4294964224  ;;  %v774_v0 = vld [vmem:[#allocation2 + $0xac] sm:$0xf]  ;;  %v733_v1 = vld [vmem:[#allocation2 + $0xb4] sm:$0xf0] }
   0x6   :  { %v771_v2 = vld [vmem:[#allocation2 + $0x94] sm:$0xf]  ;;  %v866_v3 = vor.u32 %v774_v0, %v733_v1  ;;  %v721_v4 = vld [vmem:[#allocation2 + $0x9c] sm:$0xf0]  ;;  %v768_v6 = vld [vmem:[#allocation2 + $0x7c] sm:$0xf] }
   0x7   :  { %v724_v5 = vor.u32 %v771_v2, %v721_v4  ;;  %v709_v7 = vld [vmem:[#allocation2 + $0x84] sm:$0xf0]  ;;  %v775_v9 = vld [vmem:[#allocation2 + $0xb0] sm:$0xf0]  ;;  %v719_v11 = vld [vmem:[#allocation2 + $0x90] sm:$0xf] }
   0x8   :  { %224 = vmatpush.bf16.msra.mxu1 %v866_v3  ;;  %v731_v8 = vld [vmem:[#allocation2 + $0xa8] sm:$0xf]  ;;  %v772_v12 = vld [vmem:[#allocation2 + $0x98] sm:$0xf0]  ;;  %v712_v13 = vor.u32 %v768_v6, %v709_v7  ;;  %v765_v14 = vld [vmem:[#allocation2 + $0x64] sm:$0xf] }
   0x9   :  { %v732_v10 = vor.u32 %v775_v9, %v731_v8  ;;  %v720_v15 = vor.u32 %v772_v12, %v719_v11  ;;  %v697_v16 = vld [vmem:[#allocation2 + $0x6c] sm:$0xf0]  ;;  %v707_v17 = vld [vmem:[#allocation2 + $0x78] sm:$0xf]  ;;  %v769_v18 = vld [vmem:[#allocation2 + $0x80] sm:$0xf0] }
   0xa   :  { %v700_v19 = vor.u32 %v765_v14, %v697_v16  ;;  %v762_v20 = vld [vmem:[#allocation2 + $0x4c] sm:$0xf]  ;;  %v708_v21 = vor.u32 %v769_v18, %v707_v17  ;;  %v685_v22 = vld [vmem:[#allocation2 + $0x54] sm:$0xf0]  ;;  %v695_v23 = vld [vmem:[#allocation2 + $0x60] sm:$0xf] }
   0xb   :  { %205 = vmatpush.bf16.msra.mxu0 %v732_v10  ;;  %v766_v24 = vld [vmem:[#allocation2 + $0x68] sm:$0xf0]  ;;  %v688_v25 = vor.u32 %v762_v20, %v685_v22  ;;  %v759_v26 = vld [vmem:[#allocation2 + $0x34] sm:$0xf]  ;;  %v673_v28 = vld [vmem:[#allocation2 + $0x3c] sm:$0xf0] }
   0xc   :  { %225 = vmatpush.bf16.msra.mxu1 %v724_v5  ;;  %v696_v27 = vor.u32 %v766_v24, %v695_v23  ;;  %v683_v29 = vld [vmem:[#allocation2 + $0x48] sm:$0xf]  ;;  %v763_v30 = vld [vmem:[#allocation2 + $0x50] sm:$0xf0]  ;;  %v676_v31 = vor.u32 %v759_v26, %v673_v28  ;;  %v756_v32 = vld [vmem:[#allocation2 + $0x1c] sm:$0xf] }
   0xd   :  { %v684_v33 = vor.u32 %v763_v30, %v683_v29  ;;  %v661_v34 = vld [vmem:[#allocation2 + $0x24] sm:$0xf0]  ;;  %v671_v35 = vld [vmem:[#allocation2 + $0x30] sm:$0xf]  ;;  %v760_v36 = vld [vmem:[#allocation2 + $0x38] sm:$0xf0] }
   0xe   :  { %v664_v37 = vor.u32 %v756_v32, %v661_v34  ;;  %v753_v38 = vld [vmem:[#allocation2 + $0x4] sm:$0xf]  ;;  %v672_v39 = vor.u32 %v760_v36, %v671_v35  ;;  %v649_v40 = vld [vmem:[#allocation2 + $0xc] sm:$0xf0]  ;;  %v659_v41 = vld [vmem:[#allocation2 + $0x18] sm:$0xf] }
   0xf   :  { %206 = vmatpush.bf16.msra.mxu0 %v720_v15  ;;  %v757_v42 = vld [vmem:[#allocation2 + $0x20] sm:$0xf0]  ;;  %v652_v43 = vor.u32 %v753_v38, %v649_v40  ;;  %v65_v45 = vld [vmem:[%s1026_s0 + $0x8] sm:$0xff]  ;;  %v647_v47 = vld [vmem:[#allocation2] sm:$0xf]  ;;  %vm287_vm0 = vcmask 244736  }
  0x10   :  { %226 = vmatpush.bf16.msra.mxu1 %v712_v13  ;;  %v64_v44 = vld [vmem:[%s1026_s0] sm:$0xff]  ;;  %v660_v46 = vor.u32 %v757_v42, %v659_v41  ;;  %v754_v48 = vld [vmem:[#allocation2 + $0x8] sm:$0xf0]  ;;  %v66_v51 = vld [vmem:[%s1026_s0 + $0x10] sm:$0xff]  ;;  %vm297_vm1 = vcmask 242688   ;;  %vm393_vm2 = vcmask 1046528  }
  0x11   :  { %v875_v49 = vpack.c.bf16 %v65_v45, %v64_v44  ;;  %v648_v50 = vor.u32 %v754_v48, %v647_v47  ;;  %v67_v52 = vld [vmem:[%s1026_s0 + $0x18] sm:$0x3f]  ;;  %v893_v57 = vld [vmem:[%s1028_s2] sm:$0x7]  ;;  %v773_v17 = vld [vmem:[#allocation2 + $0xa0] sm:$0xf0] }
  0x12   :  { %v886_v53 = vpack.c.bf16 %v67_v52, %v66_v51  ;;  %v896_v59 = vperm.slane %v893_v57, 1  ;;  %v776_v14 = vld [vmem:[#allocation2 + $0xb8] sm:$0xf0]  ;;  %v727_v16 = vld [vmem:[#allocation2 + $0x98] sm:$0xf]  ;;  %v743_v32 = vld [vmem:[%s1026_s0 + $0x20] sm:$0xff] }
  0x13   :  { %207 = vmatpush.bf16.msra.mxu0 %v708_v21  ;;  %v728_v18 = vor.u32 %v773_v17, %v727_v16  ;;  %v770_v20 = vld [vmem:[#allocation2 + $0x88] sm:$0xf0]  ;;  %v703_v22 = vld [vmem:[#allocation2 + $0x68] sm:$0xf]  ;;  %v767_v23 = vld [vmem:[#allocation2 + $0x70] sm:$0xf0] }
  0x14   :  { %227 = vmatpush.bf16.msra.mxu1 %v700_v19  ;;  %v704_v24 = vor.u32 %v767_v23, %v703_v22  ;;  %v691_v26 = vld [vmem:[#allocation2 + $0x50] sm:$0xf]  ;;  %v679_v30 = vld [vmem:[#allocation2 + $0x38] sm:$0xf]  ;;  %v758_v38 = vld [vmem:[#allocation2 + $0x28] sm:$0xf0] }
  0x15   :  { %v655_v41 = vld [vmem:[#allocation2 + $0x8] sm:$0xf]  ;;  %v755_v42 = vld [vmem:[#allocation2 + $0x10] sm:$0xf0]  ;;  %v746_v47 = vld [vmem:[%s1026_s0 + $0x38] sm:$0x3f] }
  0x16   :  { %v944_v16 = vperm.slane %v893_v57, 2 }
  0x17   :  { %208 = vmatpush.bf16.msra.mxu0 %v696_v27 }
  0x18   :  { %228 = vmatpush.bf16.msra.mxu1 %v688_v25 }
  0x1b   :  { %209 = vmatpush.bf16.msra.mxu0 %v684_v33 }
  0x1c   :  { %229 = vmatpush.bf16.msra.mxu1 %v676_v31 }
  0x1f   :  { %210 = vmatpush.bf16.msra.mxu0 %v672_v39 }
  0x20   :  { %230 = vmatpush.bf16.msra.mxu1 %v664_v37 }
  0x23   :  { %211 = vmatpush.bf16.msra.mxu0 %v660_v46 }
  0x24   :  { %231 = vmatpush.bf16.msra.mxu1 %v652_v43 }
  0x27   :  { %232 = vmatmul.bf16.vlgmr.msra.gmra.mxu1 %v875_v49  ;;  %212 = vmatpush.bf16.msra.mxu0 %v648_v50 }
  0x28   :  { %446 = vmatpush.bf16.msrb.mxu1 %v866_v3  ;;  %v903_v3 = vperm.slane %v893_v57, 0 }
  0x2a   :  { %213 = vmatmul.bf16.vlgmr.msra.gmra.mxu0 %v875_v49 }
  0x2b   :  { %427 = vmatpush.bf16.msrb.mxu0 %v732_v10 }
  0x2c   :  { %447 = vmatpush.bf16.msrb.mxu1 %v724_v5 }
  0x2f   :  { %428 = vmatpush.bf16.msrb.mxu0 %v720_v15 }
  0x30   :  { %448 = vmatpush.bf16.msrb.mxu1 %v712_v13  ;;  %v739_v13 = vld [vmem:[#allocation2 + $0xb0] sm:$0xf] }
  0x31   :  { %v740_v15 = vor.u32 %v776_v14, %v739_v13 }
  0x33   :  { %429 = vmatpush.bf16.msrb.mxu0 %v708_v21  ;;  %243 = vmatpush.bf16.msra.mxu2 %v740_v15 }
  0x34   :  { %449 = vmatpush.bf16.msrb.mxu1 %v700_v19  ;;  %v715_v19 = vld [vmem:[#allocation2 + $0x80] sm:$0xf] }
  0x35   :  { %v716_v21 = vor.u32 %v770_v20, %v715_v19 }
  0x37   :  { %430 = vmatpush.bf16.msrb.mxu0 %v696_v27  ;;  %237 = vmatmul.bf16.gmra.mxu1 %v886_v53  ;;  %v764_v27 = vld [vmem:[#allocation2 + $0x58] sm:$0xf0] }
  0x38   :  { %450 = vmatpush.bf16.msrb.mxu1 %v688_v25  ;;  %244 = vmatpush.bf16.msra.mxu2 %v728_v18  ;;  %v692_v29 = vor.u32 %v764_v27, %v691_v26 }
  0x3a   :  { %218 = vmatmul.bf16.gmra.mxu0 %v886_v53 }
  0x3b   :  { %431 = vmatpush.bf16.msrb.mxu0 %v684_v33  ;;  %v744_v33 = vld [vmem:[%s1026_s0 + $0x28] sm:$0xff] }
  0x3c   :  { %451 = vmatpush.bf16.msrb.mxu1 %v676_v31  ;;  %245 = vmatpush.bf16.msra.mxu2 %v716_v21  ;;  %v761_v31 = vld [vmem:[#allocation2 + $0x40] sm:$0xf0]  ;;  %v425_v35 = vpack.c.bf16 %v744_v33, %v743_v32 }
  0x3d   :  { %v680_v34 = vor.u32 %v761_v31, %v679_v30 }
  0x3f   :  { %432 = vmatpush.bf16.msrb.mxu0 %v672_v39 }
  0x40   :  { %452 = vmatpush.bf16.msrb.mxu1 %v664_v37  ;;  %246 = vmatpush.bf16.msra.mxu2 %v704_v24  ;;  %v667_v37 = vld [vmem:[#allocation2 + $0x20] sm:$0xf] }
  0x41   :  { %v668_v40 = vor.u32 %v758_v38, %v667_v37 }
  0x43   :  { %433 = vmatpush.bf16.msrb.mxu0 %v660_v46  ;;  %v745_v46 = vld [vmem:[%s1026_s0 + $0x30] sm:$0xff] }
  0x44   :  { %453 = vmatpush.bf16.msrb.mxu1 %v652_v43  ;;  %247 = vmatpush.bf16.msra.mxu2 %v692_v29  ;;  %v656_v43 = vor.u32 %v755_v42, %v655_v41  ;;  %v426_v48 = vpack.c.bf16 %v746_v47, %v745_v46 }
  0x47   :  { %434 = vmatpush.bf16.msrb.mxu0 %v648_v50  ;;  %454 = vmatmul.bf16.vlgmr.msrb.gmra.mxu1 %v425_v35 }
  0x48   :  { %248 = vmatpush.bf16.msra.mxu2 %v680_v34 }
  0x4a   :  { %435 = vmatmul.bf16.vlgmr.msrb.gmra.mxu0 %v425_v35 }
  0x4c   :  { %249 = vmatpush.bf16.msra.mxu2 %v668_v40 }
  0x50   :  { %250 = vmatpush.bf16.msra.mxu2 %v656_v43 }
  0x53   :  { %251 = vmatmul.bf16.vlgmr.msra.gmra.mxu2 %v875_v49 }
  0x54   :  { %465 = vmatpush.bf16.msrb.mxu2 %v740_v15 }
  0x57   :  { %459 = vmatmul.bf16.gmra.mxu1 %v426_v48 }
  0x58   :  { %466 = vmatpush.bf16.msrb.mxu2 %v728_v18 }
  0x5a   :  { %440 = vmatmul.bf16.gmra.mxu0 %v426_v48 }
  0x5c   :  { %467 = vmatpush.bf16.msrb.mxu2 %v716_v21 }
  0x60   :  { %468 = vmatpush.bf16.msrb.mxu2 %v704_v24 }
  0x63   :  { %256 = vmatmul.bf16.gmra.mxu2 %v886_v53 }
  0x64   :  { %469 = vmatpush.bf16.msrb.mxu2 %v692_v29 }
  0x68   :  { %470 = vmatpush.bf16.msrb.mxu2 %v680_v34 }
  0x6c   :  { %471 = vmatpush.bf16.msrb.mxu2 %v668_v40 }
  0x70   :  { %472 = vmatpush.bf16.msrb.mxu2 %v656_v43 }
  0x73   :  { %473 = vmatmul.bf16.vlgmr.msrb.gmra.mxu2 %v425_v35 }
  0x83   :  { %478 = vmatmul.bf16.gmra.mxu2 %v426_v48 }
  0xa4   :  { %v233_v54 = vpop.f32.mrf.mxu1 }
  0xa5   :  { %v234_v2 = vadd.f32 %v233_v54, %v896_v59 }
  0xa7   :  { %v214_v58 = vpop.f32.mrf.mxu0 }
  0xa8   :  { %v215_v5 = vadd.f32 %v214_v58, %v903_v3 }
  0xac   :  { %v235_v55 = vpop.f32.mrf.mxu1 }
  0xad   :  { %v236_v0 = vadd.f32 %v235_v55, %v896_v59 }
  0xaf   :  { %v216_v1 = vpop.f32.mrf.mxu0  ;;  %v264_v4 = vpack.c.bf16 %v236_v0, %v234_v2 }
  0xb0   :  { %v217_v6 = vadd.f32 %v216_v1, %v903_v3 }
  0xb2   :  { %v262_v8 = vpack.c.bf16 %v217_v6, %v215_v5 }
  0xb4   :  { %v238_v56 = vpop.f32.mrf.mxu1 }
  0xb5   :  { %v239_v61 = vadd.f32 %v238_v56, %v896_v59 }
  0xb7   :  { %v219_v7 = vpop.f32.mrf.mxu0 }
  0xb8   :  { %v220_v10 = vadd.f32 %v219_v7, %v903_v3 }
  0xbc   :  { %v240_v60 = vpop.f32.mrf.mxu1 }
  0xbd   :  { %v241_v62 = vadd.f32 %v240_v60, %v896_v59 }
  0xbf   :  { %v265_v63 = vpack.c.bf16 %v241_v62, %v239_v61  ;;  %v221_v9 = vpop.f32.mrf.mxu0 }
  0xc0   :  { %v222_v11 = vadd.f32 %v221_v9, %v903_v3 }
  0xc1   :  { %274 = vmatpush.bf16.xpose.msra.mxu3 %v265_v63 }
  0xc2   :  { %v263_v12 = vpack.c.bf16 %v222_v11, %v220_v10 }
  0xc9   :  { %275 = vmatpush.bf16.xpose.msra.mxu3 %v264_v4 }
  0xd0   :  { %276 = vmatmul.bf16.vlgmr.msra.gmra.mxu3 %v262_v8  ;;  %v455_v8 = vpop.f32.mrf.mxu1 }
  0xd6   :  { %v252_v11 = vpop.f32.mrf.mxu2 }
  0xd7   :  { %v253_v21 = vadd.f32 %v252_v11, %v944_v16 }
  0xde   :  { %v254_v13 = vpop.f32.mrf.mxu2 }
  0xdf   :  { %v255_v22 = vadd.f32 %v254_v13, %v944_v16 }
  0xe0   :  { %281 = vmatmul.bf16.gmra.mxu3 %v263_v12  ;;  %v457_v12 = vpop.f32.mrf.mxu1 }
  0xe1   :  { %v266_v57 = vpack.c.bf16 %v255_v22, %v253_v21  ;;  %v458_v29 = vadd.f32 %v457_v12, %v896_v59 }
  0xe6   :  { %v257_v15 = vpop.f32.mrf.mxu2 }
  0xe7   :  { %v258_v17 = vadd.f32 %v257_v15, %v944_v16 }
  0xe8   :  { %v460_v14 = vpop.f32.mrf.mxu1 }
  0xe9   :  { %v461_v24 = vadd.f32 %v460_v14, %v896_v59 }
  0xee   :  { %v259_v18 = vpop.f32.mrf.mxu2 }
  0xef   :  { %v260_v20 = vadd.f32 %v259_v18, %v944_v16  ;;  %v436_v18 = vpop.f32.mrf.mxu0 }
  0xf0   :  { %v462_v19 = vpop.f32.mrf.mxu1 }
  0xf1   :  { %v267_v23 = vpack.c.bf16 %v260_v20, %v258_v17 }
  0xf3   :  { %v395_v26 = vsel %vm393_vm2, %v267_v23, 0 }
  0xf4   :  { %403 = vmatpush.bf16.msrb.mxu3 %v395_v26 }
  0xf6   :  { %v474_v43 = vpop.f32.mrf.mxu2 }
  0xf8   :  { %404 = vmatpush.bf16.msrb.mxu3 %v266_v57 }
 0x153   :  { %v277_v25 = vpop.f32.mrf.mxu3 }
 0x154   :  { %v288_v28 = vsel %vm287_vm0, %v277_v25, -inf }
 0x155   :  { %289 = vmax.xlane.f32.xlu0 %v288_v28  ;;  %v456_v28 = vadd.f32 %v455_v8, %v896_v59 }
 0x157   :  { %v486_v30 = vpack.c.bf16 %v458_v29, %v456_v28 }
 0x15b   :  { %v279_v36 = vpop.f32.mrf.mxu3 }
 0x15c   :  { %v291_v39 = vsel %vm287_vm0, %v279_v36, -inf }
 0x15d   :  { %292 = vmax.xlane.f32.xlu0 %v291_v39 }
 0x163   :  { %v282_v44 = vpop.f32.mrf.mxu3 }
 0x164   :  { %v294_v45 = vsel %vm287_vm0, %v282_v44, -inf }
 0x165   :  { %295 = vmax.xlane.f32.xlu1 %v294_v45 }
 0x16b   :  { %v284_v50 = vpop.f32.mrf.mxu3 }
 0x16c   :  { %v298_v51 = vsel %vm297_vm1, %v284_v50, -inf }
 0x16d   :  { %299 = vmax.xlane.f32.xlu1 %v298_v51 }
 0x1c8   :  { %v290_v52 = vpop.xlane.xlu0 %289 }
 0x1c9   :  { %v301_v54 = vsub.f32 %v277_v25, %v290_v52  ;;  %v463_v25 = vadd.f32 %v462_v19, %v896_v59 }
 0x1cb   :  { %v305_v49 = vmul.f32 1.442695, %v301_v54  ;;  %v487_v27 = vpack.c.bf16 %v463_v25, %v461_v24  ;;  %v438_v24 = vpop.f32.mrf.mxu0  ;;  %v437_v25 = vadd.f32 %v436_v18, %v903_v3 }
 0x1cc   :  { %v439_v26 = vadd.f32 %v438_v24, %v903_v3 }
 0x1cd   :  { %782 = vpow2.f32 %v305_v49  ;;  %496 = vmatpush.bf16.xpose.msra.mxu3 %v487_v27 }
 0x1ce   :  { %v484_v27 = vpack.c.bf16 %v439_v26, %v437_v25 }
 0x1d0   :  { %v293_v55 = vpop.xlane.xlu0 %292 }
 0x1d1   :  { %v302_v56 = vsub.f32 %v279_v36, %v293_v55 }
 0x1d3   :  { %v927_v58 = vpop.eup %782  ;;  %v307_v60 = vmul.f32 1.442695, %v302_v56  ;;  %v441_v57 = vpop.f32.mrf.mxu0 }
 0x1d4   :  { %v313_v61 = vsel %vm287_vm0, %v927_v58, 0.0  ;;  %v442_v29 = vadd.f32 %v441_v57, %v903_v3 }
 0x1d5   :  { %784 = vpow2.f32 %v307_v60  ;;  %314 = vadd.xlane.f32.xlu2 %v313_v61  ;;  %497 = vmatpush.bf16.xpose.msra.mxu3 %v486_v30 }
 0x1d8   :  { %v296_v53 = vpop.xlane.xlu1 %295 }
 0x1d9   :  { %v303_v62 = vsub.f32 %v282_v44, %v296_v53 }
 0x1db   :  { %v931_v63 = vpop.eup %784  ;;  %v309_v0 = vmul.f32 1.442695, %v303_v62  ;;  %v443_v28 = vpop.f32.mrf.mxu0 }
 0x1dc   :  { %v316_v1 = vsel %vm287_vm0, %v931_v63, 0.0  ;;  %v444_v30 = vadd.f32 %v443_v28, %v903_v3 }
 0x1dd   :  { %786 = vpow2.f32 %v309_v0  ;;  %317 = vadd.xlane.f32.xlu2 %v316_v1 }
 0x1e0   :  { %v300_v2 = vpop.xlane.xlu1 %299 }
 0x1e1   :  { %v304_v4 = vsub.f32 %v284_v50, %v300_v2 }
 0x1e3   :  { %v935_v5 = vpop.eup %786  ;;  %v311_v6 = vmul.f32 1.442695, %v304_v4 }
 0x1e4   :  { %v319_v7 = vsel %vm287_vm0, %v935_v5, 0.0 }
 0x1e5   :  { %788 = vpow2.f32 %v311_v6  ;;  %320 = vadd.xlane.f32.xlu0 %v319_v7 }
 0x1eb   :  { %v939_v9 = vpop.eup %788 }
 0x1ec   :  { %v322_v10 = vsel %vm297_vm1, %v939_v9, 0.0 }
 0x1ed   :  { %323 = vadd.xlane.f32.xlu1 %v322_v10 }
 0x248   :  { %v315_v31 = vpop.xlane.xlu2 %314 }
 0x249   :  { %790 = vrcp.f32 %v315_v31  ;;  %v336_v41 = vand.u32 2147483648, %v315_v31  ;;  %vm330_vm4 = vweird.f32 %v315_v31  ;;  %v334_v59 = vand.u32 2147483647, %v315_v31 }
 0x24b   :  { %v337_v48 = vor.u32 1.1754944e-38, %v336_v41  ;;  %vm335_vm8 = vcmp.eq.f32.partialorder %v334_v59, 8.507059e+37 }
 0x24f   :  { %v791_v32 = vpop.eup %790 }
 0x250   :  { %v326_v33 = vmul.f32 %v791_v32, %v315_v31  ;;  %v318_v34 = vpop.xlane.xlu2 %317  ;;  %vm331_vm3 = vweird.f32 %v791_v32  ;;  %v485_v31 = vpack.c.bf16 %v444_v30, %v442_v29 }
 0x251   :  { %792 = vrcp.f32 %v318_v34  ;;  %vm955_vm5 = vmor %vm330_vm4, %vm331_vm3  ;;  %v351_v45 = vand.u32 2147483648, %v318_v34  ;;  %v349_v47 = vand.u32 2147483647, %v318_v34  ;;  %vm345_vm7 = vweird.f32 %v318_v34 }
 0x252   :  { %v327_v35 = vsub.f32 1.0, %v326_v33 }
 0x253   :  { %v352_v54 = vor.u32 1.1754944e-38, %v351_v45  ;;  %vm350_vm10 = vcmp.eq.f32.partialorder %v349_v47, 8.507059e+37 }
 0x254   :  { %v328_v36 = vmul.f32 %v791_v32, %v327_v35 }
 0x256   :  { %v329_v40 = vadd.f32 %v791_v32, %v328_v36 }
 0x257   :  { %v793_v37 = vpop.eup %792 }
 0x258   :  { %v341_v38 = vmul.f32 %v793_v37, %v318_v34  ;;  %v321_v39 = vpop.xlane.xlu0 %320  ;;  %vm346_vm6 = vweird.f32 %v793_v37  ;;  %v333_v46 = vsel %vm955_vm5, %v791_v32, %v329_v40 }
 0x259   :  { %794 = vrcp.f32 %v321_v39  ;;  %vm347_vm9 = vmor %vm345_vm7, %vm346_vm6  ;;  %v338_v56 = vsel %vm335_vm8, %v337_v48, %v333_v46  ;;  %v366_v7 = vand.u32 2147483648, %v321_v39  ;;  %vm360_vm12 = vweird.f32 %v321_v39 }
 0x25a   :  { %v342_v42 = vsub.f32 1.0, %v341_v38  ;;  %v339_v53 = vmul.f32 %v927_v58, %v338_v56  ;;  %v364_v8 = vand.u32 2147483647, %v321_v39 }
 0x25b   :  { %v367_v14 = vor.u32 1.1754944e-38, %v366_v7 }
 0x25c   :  { %v343_v44 = vmul.f32 %v793_v37, %v342_v42  ;;  %vm365_vm15 = vcmp.eq.f32.partialorder %v364_v8, 8.507059e+37 }
 0x25e   :  { %v344_v50 = vadd.f32 %v793_v37, %v343_v44 }
 0x25f   :  { %v795_v51 = vpop.eup %794 }
 0x260   :  { %v348_v52 = vsel %vm347_vm9, %v793_v37, %v344_v50  ;;  %v356_v49 = vmul.f32 %v795_v51, %v321_v39  ;;  %v324_v55 = vpop.xlane.xlu1 %323  ;;  %vm361_vm11 = vweird.f32 %v795_v51  ;;  %v476_v50 = vpop.f32.mrf.mxu2 }
 0x261   :  { %796 = vrcp.f32 %v324_v55  ;;  %v353_v61 = vsel %vm350_vm10, %v352_v54, %v348_v52  ;;  %vm362_vm13 = vmor %vm360_vm12, %vm361_vm11  ;;  %v381_v11 = vand.u32 2147483648, %v324_v55  ;;  %v379_v13 = vand.u32 2147483647, %v324_v55 }
 0x262   :  { %v357_v60 = vsub.f32 1.0, %v356_v49  ;;  %v354_v62 = vmul.f32 %v931_v63, %v353_v61  ;;  %vm375_vm3 = vweird.f32 %v324_v55  ;;  %v477_v7 = vadd.f32 %v476_v50, %v944_v16 }
 0x263   :  { %v382_v15 = vor.u32 1.1754944e-38, %v381_v11  ;;  %vm380_vm5 = vcmp.eq.f32.partialorder %v379_v13, 8.507059e+37 }
 0x264   :  { %v358_v0 = vmul.f32 %v795_v51, %v357_v60  ;;  %v385_v1 = vpack.c.bf16 %v354_v62, %v339_v53 }
 0x266   :  { %741 = vmatmul.msk.bf16.vlgmr.msrb.gmra.mxu3 %vm287_vm0, %v385_v1  ;;  %v359_v4 = vadd.f32 %v795_v51, %v358_v0 }
 0x267   :  { %v797_v2 = vpop.eup %796 }
 0x268   :  { %v371_v6 = vmul.f32 %v797_v2, %v324_v55  ;;  %vm376_vm14 = vweird.f32 %v797_v2  ;;  %v363_v58 = vsel %vm362_vm13, %v795_v51, %v359_v4  ;;  %v479_v56 = vpop.f32.mrf.mxu2 }
 0x269   :  { %vm377_vm4 = vmor %vm375_vm3, %vm376_vm14  ;;  %v368_v17 = vsel %vm365_vm15, %v367_v14, %v363_v58  ;;  %v480_v1 = vadd.f32 %v479_v56, %v944_v16 }
 0x26a   :  { %v372_v10 = vsub.f32 1.0, %v371_v6  ;;  %v369_v21 = vmul.f32 %v935_v5, %v368_v17  ;;  %v475_v6 = vadd.f32 %v474_v43, %v944_v16 }
 0x26c   :  { %v373_v12 = vmul.f32 %v797_v2, %v372_v10 }
 0x26e   :  { %v374_v63 = vadd.f32 %v797_v2, %v373_v12  ;;  %v488_v12 = vpack.c.bf16 %v477_v7, %v475_v6 }
 0x270   :  { %v378_v19 = vsel %vm377_vm4, %v797_v2, %v374_v63  ;;  %v481_v2 = vpop.f32.mrf.mxu2 }
 0x271   :  { %v383_v20 = vsel %vm380_vm5, %v382_v15, %v378_v19  ;;  %v482_v4 = vadd.f32 %v481_v2, %v944_v16 }
 0x272   :  { %v384_v22 = vmul.f32 %v939_v9, %v383_v20 }
 0x273   :  { %v489_v8 = vpack.c.bf16 %v482_v4, %v480_v1 }
 0x274   :  { %v386_v23 = vpack.c.bf16 %v384_v22, %v369_v21 }
 0x275   :  { %v614_v10 = vsel %vm393_vm2, %v489_v8, 0 }
 0x276   :  { %742 = vmatmul.msk.bf16.gmra.mxu3 %vm287_vm0, %v386_v23  ;;  %622 = vmatpush.bf16.msra.mxu0 %v614_v10 }
 0x277   :  { %777 = vmatpush.bf16.msra.mxu1 %v614_v10 }
 0x27a   :  { %623 = vmatpush.bf16.msra.mxu0 %v488_v12 }
 0x27b   :  { %778 = vmatpush.bf16.msra.mxu1 %v488_v12 }
 0x286   :  { %498 = vmatmul.bf16.vlgmr.msra.gmra.mxu3 %v484_v27 }
 0x296   :  { %503 = vmatmul.bf16.gmra.mxu3 %v485_v31 }
 0x2e9   :  { %v406_v5 = vpop.f32.mrf.mxu3 }
 0x2ea   :  { %416 = vst [vmem:[%s1029_s3] sm:$0xff] %v406_v5 }
 0x2f1   :  { %v408_v9 = vpop.f32.mrf.mxu3 }
 0x2f2   :  { %417 = vst [vmem:[%s1029_s3 + $0x8] sm:$0xff] %v408_v9 }
 0x2f9   :  { %v411_v32 = vpop.f32.mrf.mxu3 }
 0x2fa   :  { %418 = vst [vmem:[%s1029_s3 + $0x10] sm:$0xff] %v411_v32 }
 0x301   :  { %v413_v33 = vpop.f32.mrf.mxu3 }
 0x302   :  { %419 = vst [vmem:[%s1029_s3 + $0x18] sm:$0x3f] %v413_v33 }
 0x309   :  { %v499_v3 = vpop.f32.mrf.mxu3 }
 0x30a   :  { %v509_v34 = vsel %vm287_vm0, %v499_v3, -inf }
 0x30b   :  { %510 = vmax.xlane.f32.xlu2 %v509_v34 }
 0x311   :  { %v501_v35 = vpop.f32.mrf.mxu3 }
 0x312   :  { %v512_v36 = vsel %vm287_vm0, %v501_v35, -inf }
 0x313   :  { %513 = vmax.xlane.f32.xlu0 %v512_v36 }
 0x319   :  { %v504_v37 = vpop.f32.mrf.mxu3 }
 0x31a   :  { %v515_v38 = vsel %vm287_vm0, %v504_v37, -inf }
 0x31b   :  { %516 = vmax.xlane.f32.xlu1 %v515_v38 }
 0x321   :  { %v506_v39 = vpop.f32.mrf.mxu3 }
 0x322   :  { %v518_v40 = vsel %vm297_vm1, %v506_v39, -inf }
 0x323   :  { %519 = vmax.xlane.f32.xlu2 %v518_v40 }
 0x37e   :  { %v511_v41 = vpop.xlane.xlu2 %510 }
 0x37f   :  { %v521_v42 = vsub.f32 %v499_v3, %v511_v41 }
 0x381   :  { %v525_v59 = vmul.f32 1.442695, %v521_v42 }
 0x383   :  { %798 = vpow2.f32 %v525_v59 }
 0x386   :  { %v514_v44 = vpop.xlane.xlu0 %513 }
 0x387   :  { %v522_v45 = vsub.f32 %v501_v35, %v514_v44 }
 0x389   :  { %v987_v46 = vpop.eup %798  ;;  %v527_v47 = vmul.f32 1.442695, %v522_v45 }
 0x38a   :  { %v533_v48 = vsel %vm287_vm0, %v987_v46, 0.0 }
 0x38b   :  { %800 = vpow2.f32 %v527_v47  ;;  %534 = vadd.xlane.f32.xlu0 %v533_v48 }
 0x38e   :  { %v517_v51 = vpop.xlane.xlu1 %516 }
 0x38f   :  { %v523_v52 = vsub.f32 %v504_v37, %v517_v51 }
 0x391   :  { %v991_v54 = vpop.eup %800  ;;  %v529_v49 = vmul.f32 1.442695, %v523_v52 }
 0x392   :  { %v536_v55 = vsel %vm287_vm0, %v991_v54, 0.0 }
 0x393   :  { %802 = vpow2.f32 %v529_v49  ;;  %537 = vadd.xlane.f32.xlu1 %v536_v55 }
 0x396   :  { %v520_v60 = vpop.xlane.xlu2 %519 }
 0x397   :  { %v524_v61 = vsub.f32 %v506_v39, %v520_v60 }
 0x399   :  { %v995_v53 = vpop.eup %802  ;;  %v531_v62 = vmul.f32 1.442695, %v524_v61 }
 0x39a   :  { %v539_v0 = vsel %vm287_vm0, %v995_v53, 0.0 }
 0x39b   :  { %804 = vpow2.f32 %v531_v62  ;;  %540 = vadd.xlane.f32.xlu2 %v539_v0 }
 0x3a1   :  { %v1004_v11 = vpop.eup %804 }
 0x3a2   :  { %v542_v13 = vsel %vm297_vm1, %v1004_v11, 0.0 }
 0x3a3   :  { %543 = vadd.xlane.f32.xlu0 %v542_v13 }
 0x3fe   :  { %v535_v58 = vpop.xlane.xlu0 %534 }
 0x3ff   :  { %806 = vrcp.f32 %v535_v58  ;;  %v556_v22 = vand.u32 2147483648, %v535_v58  ;;  %vm550_vm6 = vweird.f32 %v535_v58  ;;  %v554_v23 = vand.u32 2147483647, %v535_v58 }
 0x401   :  { %v557_v28 = vor.u32 1.1754944e-38, %v556_v22  ;;  %vm555_vm8 = vcmp.eq.f32.partialorder %v554_v23, 8.507059e+37 }
 0x405   :  { %v807_v14 = vpop.eup %806 }
 0x406   :  { %v546_v63 = vmul.f32 %v807_v14, %v535_v58  ;;  %v538_v15 = vpop.xlane.xlu1 %537  ;;  %vm551_vm2 = vweird.f32 %v807_v14 }
 0x407   :  { %808 = vrcp.f32 %v538_v15  ;;  %vm552_vm1 = vmor %vm550_vm6, %vm551_vm2  ;;  %v571_v25 = vand.u32 2147483648, %v538_v15  ;;  %v569_v27 = vand.u32 2147483647, %v538_v15  ;;  %vm565_vm9 = vweird.f32 %v538_v15 }
 0x408   :  { %v547_v16 = vsub.f32 1.0, %v546_v63 }
 0x409   :  { %v572_v5 = vor.u32 1.1754944e-38, %v571_v25  ;;  %vm570_vm11 = vcmp.eq.f32.partialorder %v569_v27, 8.507059e+37 }
 0x40a   :  { %v548_v17 = vmul.f32 %v807_v14, %v547_v16 }
 0x40c   :  { %v549_v19 = vadd.f32 %v807_v14, %v548_v17 }
 0x40d   :  { %v809_v18 = vpop.eup %808 }
 0x40e   :  { %v561_v20 = vmul.f32 %v809_v18, %v538_v15  ;;  %v541_v21 = vpop.xlane.xlu2 %540  ;;  %v553_v26 = vsel %vm552_vm1, %v807_v14, %v549_v19  ;;  %vm566_vm7 = vweird.f32 %v809_v18 }
 0x40f   :  { %810 = vrcp.f32 %v541_v21  ;;  %v558_v31 = vsel %vm555_vm8, %v557_v28, %v553_v26  ;;  %vm567_vm10 = vmor %vm565_vm9, %vm566_vm7  ;;  %v586_v42 = vand.u32 2147483648, %v541_v21  ;;  %vm580_vm13 = vweird.f32 %v541_v21 }
 0x410   :  { %v562_v24 = vsub.f32 1.0, %v561_v20  ;;  %v559_v34 = vmul.f32 %v987_v46, %v558_v31  ;;  %v584_v59 = vand.u32 2147483647, %v541_v21 }
 0x411   :  { %v587_v48 = vor.u32 1.1754944e-38, %v586_v42 }
 0x412   :  { %v563_v57 = vmul.f32 %v809_v18, %v562_v24  ;;  %vm585_vm3 = vcmp.eq.f32.partialorder %v584_v59, 8.507059e+37 }
 0x414   :  { %v564_v29 = vadd.f32 %v809_v18, %v563_v57 }
 0x415   :  { %v811_v30 = vpop.eup %810 }
 0x416   :  { %v568_v9 = vsel %vm567_vm10, %v809_v18, %v564_v29  ;;  %v576_v32 = vmul.f32 %v811_v30, %v541_v21  ;;  %v544_v33 = vpop.xlane.xlu0 %543  ;;  %vm581_vm12 = vweird.f32 %v811_v30 }
 0x417   :  { %v573_v3 = vsel %vm570_vm11, %v572_v5, %v568_v9  ;;  %812 = vrcp.f32 %v544_v33  ;;  %vm582_vm14 = vmor %vm580_vm13, %vm581_vm12  ;;  %v601_v44 = vand.u32 2147483648, %v544_v33  ;;  %v599_v46 = vand.u32 2147483647, %v544_v33 }
 0x418   :  { %v574_v35 = vmul.f32 %v991_v54, %v573_v3  ;;  %v577_v36 = vsub.f32 1.0, %v576_v32  ;;  %vm595_vm4 = vweird.f32 %v544_v33 }
 0x419   :  { %v602_v52 = vor.u32 1.1754944e-38, %v601_v44  ;;  %vm600_vm2 = vcmp.eq.f32.partialorder %v599_v46, 8.507059e+37 }
 0x41a   :  { %v605_v37 = vpack.c.bf16 %v574_v35, %v559_v34  ;;  %v578_v38 = vmul.f32 %v811_v30, %v577_v36 }
 0x41c   :  { %747 = vmatmul.msk.bf16.vlgmr.msra.gmra.mxu0 %vm287_vm0, %v605_v37  ;;  %v579_v40 = vadd.f32 %v811_v30, %v578_v38 }
 0x41d   :  { %v813_v39 = vpop.eup %812 }
 0x41e   :  { %v591_v41 = vmul.f32 %v813_v39, %v544_v33  ;;  %v583_v45 = vsel %vm582_vm14, %v811_v30, %v579_v40  ;;  %vm596_vm15 = vweird.f32 %v813_v39 }
 0x41f   :  { %v588_v51 = vsel %vm585_vm3, %v587_v48, %v583_v45  ;;  %vm597_vm5 = vmor %vm595_vm4, %vm596_vm15 }
 0x420   :  { %v592_v43 = vsub.f32 1.0, %v591_v41  ;;  %v589_v55 = vmul.f32 %v995_v53, %v588_v51 }
 0x422   :  { %v593_v47 = vmul.f32 %v813_v39, %v592_v43 }
 0x424   :  { %v594_v50 = vadd.f32 %v813_v39, %v593_v47 }
 0x426   :  { %v598_v54 = vsel %vm597_vm5, %v813_v39, %v594_v50 }
 0x427   :  { %v603_v49 = vsel %vm600_vm2, %v602_v52, %v598_v54 }
 0x428   :  { %v604_v56 = vmul.f32 %v1004_v11, %v603_v49 }
 0x42a   :  { %v606_v60 = vpack.c.bf16 %v604_v56, %v589_v55 }
 0x42c   :  { %748 = vmatmul.msk.bf16.vlgmr.msra.gmra.mxu1 %vm287_vm0, %v606_v60 }
 0x499   :  { %v625_v61 = vpop.f32.mrf.mxu0 }
 0x49a   :  { %749 = vst [vmem:[%s1029_s3 + $0x20] sm:$0xff] %v625_v61 }
 0x4a1   :  { %v627_v62 = vpop.f32.mrf.mxu0 }
 0x4a2   :  { %750 = vst [vmem:[%s1029_s3 + $0x28] sm:$0xff] %v627_v62 }
 0x4a9   :  { %v630_v0 = vpop.f32.mrf.mxu1 }
 0x4aa   :  { %751 = vst [vmem:[%s1029_s3 + $0x30] sm:$0xff] %v630_v0 }
 0x4b1   :  { %v632_v53 = vpop.f32.mrf.mxu1 }
 0x4b2   :  { %752 = vst [vmem:[%s1029_s3 + $0x38] sm:$0x3f] %v632_v53 }
 0x4b3   :  { %644 = vsyncpa [#allocation3], 1 }

</bundles_post_ra>
